<compile_context>
chip_gen: v5e
topology: v5e:2x2
jax: 0.10.0
libtpu: 0.0.40
codegen_flags: <defaults>
</compile_context>

<pallas_src>
import functools

import numpy as np
import jax
import jax.numpy as jnp
from jax.experimental import pallas as pl
from jax.experimental.pallas import tpu as pltpu


def _round_up(a, m):
    return ((a + m - 1) // m) * m


def _num_tensorcores():
    """Best-effort TC count per chip (2 on v7x, 1 on v5e/v6e)."""
    try:
        kind = jax.devices()[0].device_kind.lower()
    except Exception:
        return 1
    return 2 if "v7" in kind else 1


def mdn_kernel(xt_ref, w1t_ref, b1c_ref, wht_ref, bhc_ref,
               pi_ref, sigma_ref, mu_ref, *, n_gaussians):
    """Feature-major (transposed) MDN forward for one batch tile.

    xt_ref : (n_input,  block_batch)   lane-dense x^T tile
    w1t_ref: (n_hidden, n_input)       fc1 weight, transposed
    b1c_ref: (n_hidden, 1)             fc1 bias as a column
    wht_ref: (head_out, n_hidden)      fused [pi|sigma|mu] head weight, transposed
    bhc_ref: (head_out, 1)             fused head bias as a column
    pi_ref / sigma_ref / mu_ref : (G, bb) / (G, bb) / (G*n_output, bb)
    """
    xt = xt_ref[...]

    # fc1 + tanh : (n_hidden, bb)   (MXU matmul, EUP tanh)
    h = jnp.tanh(
        jnp.dot(w1t_ref[...], xt, preferred_element_type=jnp.float32)
        + b1c_ref[...]
    )

    # Single fused head matmul: rows are [pi_logits | sigma_pre | mu].
    heads = (
        jnp.dot(wht_ref[...], h, preferred_element_type=jnp.float32)
        + bhc_ref[...]
    )  # (head_out, bb)

    G = n_gaussians

    # Max-stabilized softmax over the G pi rows (sublane reduction).
    logits = heads[:G, :]
    m = jnp.max(logits, axis=0, keepdims=True)
    e = jnp.exp(logits - m)
    denom = jnp.sum(e, axis=0, keepdims=True)
    pi_ref[...] = e * pl.reciprocal(denom, approx=False)

    sigma_ref[...] = jnp.exp(heads[G:2 * G, :])
    mu_ref[...] = heads[2 * G:, :]


@functools.partial(jax.jit, static_argnames=("n_gaussians", "block_batch"))
def mdn_forward(x, w1t, b1c, wht, bhc, *, n_gaussians, block_batch=None):
    """Full MDN forward in one Pallas kernel, tiled over the batch dimension.

    Takes pre-fused / pre-transposed parameters (see `fuse_mdn_params`).
    Returns (pi, sigma, mu) in batch-major layout, matching the PyTorch module.
    """
    B, n_input = x.shape
    n_hidden = w1t.shape[0]
    head_out = wht.shape[0]
    G = n_gaussians
    n_mu = head_out - 2 * G

    # ---- batch tile selection (trace-time Python on static shapes) --------
    if block_batch is None:
        n_cores = _num_tensorcores()
        # one big tile on single-TC chips; >=2 "parallel" steps on v7x
        block_batch = min(4096, _round_up(max(1, -(-B // n_cores)), 128))
    block_batch = max(128, _round_up(block_batch, 128))  # lane-dense stores

    Bp = _round_up(B, block_batch)
    grid = (Bp // block_batch,)

    # ---- lane-dense input: x^T, padded along batch (fused under jit) ------
    xt = x.T  # (n_input, B)
    if Bp != B:
        xt = jnp.pad(xt, ((0, 0), (0, Bp - B)))

    def rep(shape):
        # weights / biases replicated across batch tiles (constant block index
        # => Pallas keeps them resident, no re-DMA per step)
        return pl.BlockSpec(shape, lambda i: (0, 0))

    in_specs = [
        pl.BlockSpec((n_input, block_batch), lambda i: (0, i)),
        rep(w1t.shape), rep(b1c.shape),
        rep(wht.shape), rep(bhc.shape),
    ]
    out_specs = [
        pl.BlockSpec((G, block_batch), lambda i: (0, i)),
        pl.BlockSpec((G, block_batch), lambda i: (0, i)),
        pl.BlockSpec((n_mu, block_batch), lambda i: (0, i)),
    ]
    out_shape = (
        jax.ShapeDtypeStruct((G, Bp), jnp.float32),
        jax.ShapeDtypeStruct((G, Bp), jnp.float32),
        jax.ShapeDtypeStruct((n_mu, Bp), jnp.float32),
    )

    pi_t, sigma_t, mu_t = pl.pallas_call(
        functools.partial(mdn_kernel, n_gaussians=G),
        out_shape=out_shape,
        grid_spec=pltpu.PrefetchScalarGridSpec(
            num_scalar_prefetch=0,
            grid=grid,
            in_specs=in_specs,
            out_specs=out_specs,
        ),
        compiler_params=pltpu.CompilerParams(
            dimension_semantics=("parallel",),
        ),
    )(xt, w1t, b1c, wht, bhc)

    # Back to batch-major; pad columns sliced off.  All fused under jit.
    pi = pi_t[:, :B].T
    sigma = sigma_t[:, :B].T
    mu = mu_t[:, :B].T
    return pi, sigma, mu


def fuse_mdn_params(params):
    """One-time parameter fusion/transpose (do NOT call per forward)."""
    (w1, b1, wpi, bpi, wsig, bsig, wmu, bmu) = params
    w1t = jnp.asarray(w1.T)                                   # (n_hidden, n_input)
    b1c = jnp.asarray(b1).reshape(-1, 1)                      # (n_hidden, 1)
    wht = jnp.concatenate([wpi, wsig, wmu], axis=1).T         # (head_out, n_hidden)
    bhc = jnp.concatenate([bpi, bsig, bmu], axis=1).reshape(-1, 1)  # (head_out, 1)
    return w1t, b1c, wht, bhc


def init_mdn_params(key, n_input, n_hidden, n_output, n_gaussians):
    """PyTorch-style uniform(-1/sqrt(fan_in), 1/sqrt(fan_in)) init; W is (in, out)."""
    def linear(key, fan_in, fan_out):
        kw, kb = jax.random.split(key)
        bound = 1.0 / np.sqrt(fan_in)
        w = jax.random.uniform(kw, (fan_in, fan_out), jnp.float32, -bound, bound)
        b = jax.random.uniform(kb, (1, fan_out), jnp.float32, -bound, bound)
        return w, b

    k1, k2, k3, k4 = jax.random.split(key, 4)
    w1, b1 = linear(k1, n_input, n_hidden)
    wpi, bpi = linear(k2, n_hidden, n_gaussians)
    wmu, bmu = linear(k3, n_hidden, n_gaussians * n_output)
    wsig, bsig = linear(k4, n_hidden, n_gaussians)
    return (w1, b1, wpi, bpi, wsig, bsig, wmu, bmu)


def mdn_forward_ref(x, params):
    (w1, b1, wpi, bpi, wsig, bsig, wmu, bmu) = params
    h = jnp.tanh(x @ w1 + b1)
    pi = jax.nn.softmax(h @ wpi + bpi, axis=-1)
    sigma = jnp.exp(h @ wsig + bsig)
    mu = h @ wmu + bmu
    return pi, sigma, mu


if __name__ == "__main__":
    # Shapes consistent with the module's forward: x is (batch, n_input).
    batch = 256
    n_input = 4
    n_hidden = 32
    n_output = 2
    n_gaussians = 5

    key = jax.random.PRNGKey(0)
    kx, kp = jax.random.split(key)
    x = jax.random.normal(kx, (batch, n_input), jnp.float32)
    params = init_mdn_params(kp, n_input, n_hidden, n_output, n_gaussians)

    # One-time fusion/transpose of parameters (hoisted out of the call path).
    fused = fuse_mdn_params(params)
    jax.block_until_ready(fused)

    pi, sigma, mu = mdn_forward(x, *fused, n_gaussians=n_gaussians)
    jax.block_until_ready((pi, sigma, mu))

    # Sanity check against pure-JAX reference.
    pi_r, sigma_r, mu_r = mdn_forward_ref(x, params)
    assert np.allclose(np.asarray(pi), np.asarray(pi_r), atol=1e-5)
    assert np.allclose(np.asarray(sigma), np.asarray(sigma_r), atol=1e-5)
    assert np.allclose(np.asarray(mu), np.asarray(mu_r), atol=1e-5)
    assert pi.shape == (batch, n_gaussians)
    assert sigma.shape == (batch, n_gaussians)
    assert mu.shape == (batch, n_gaussians * n_output)

    # Also exercise a non-tile-aligned batch (wrapper pads then slices, fused).
    x2 = jax.random.normal(kx, (37, n_input), jnp.float32)
    p2, s2, m2 = mdn_forward(x2, *fused, n_gaussians=n_gaussians)
    jax.block_until_ready((p2, s2, m2))
    p2_r, s2_r, m2_r = mdn_forward_ref(x2, params)
    assert np.allclose(np.asarray(p2), np.asarray(p2_r), atol=1e-5)
    assert np.allclose(np.asarray(s2), np.asarray(s2_r), atol=1e-5)
    assert np.allclose(np.asarray(m2), np.asarray(m2_r), atol=1e-5)

    print("KERNEL_OK")
</pallas_src>

<mosaic_0001>
module attributes {stable_mosaic.version = 11 : i64} {
  func.func @mdn_kernel(%arg0: i32, %arg1: memref<4x256xf32, #tpu.memory_space<vmem>>, %arg2: memref<32x4xf32, #tpu.memory_space<vmem>>, %arg3: memref<32x1xf32, #tpu.memory_space<vmem>>, %arg4: memref<20x32xf32, #tpu.memory_space<vmem>>, %arg5: memref<20x1xf32, #tpu.memory_space<vmem>>, %arg6: memref<5x256xf32, #tpu.memory_space<vmem>>, %arg7: memref<5x256xf32, #tpu.memory_space<vmem>>, %arg8: memref<10x256xf32, #tpu.memory_space<vmem>>) attributes {dimension_semantics = [#tpu.dimension_semantics<parallel>], iteration_bounds = array<i64: 1>, scalar_prefetch = 0 : i64, scratch_operands = 0 : i64, tpu.core_type = #tpu.core_type<tc>, window_params = [{transform_indices = @transform_0, window_bounds = array<i64: 4, 256>}, {pipeline_mode = #tpu.pipeline_mode<synchronous>, transform_indices = @transform_1, window_bounds = array<i64: 32, 4>}, {pipeline_mode = #tpu.pipeline_mode<synchronous>, transform_indices = @transform_2, window_bounds = array<i64: 32, 1>}, {pipeline_mode = #tpu.pipeline_mode<synchronous>, transform_indices = @transform_3, window_bounds = array<i64: 20, 32>}, {pipeline_mode = #tpu.pipeline_mode<synchronous>, transform_indices = @transform_4, window_bounds = array<i64: 20, 1>}, {transform_indices = @transform_5, window_bounds = array<i64: 5, 256>}, {transform_indices = @transform_6, window_bounds = array<i64: 5, 256>}, {transform_indices = @transform_7, window_bounds = array<i64: 10, 256>}]} {
    %c0 = arith.constant 0 : index
    %c0_0 = arith.constant 0 : index
    %0 = vector.load %arg1[%c0, %c0_0] : memref<4x256xf32, #tpu.memory_space<vmem>>, vector<4x256xf32>
    %c0_1 = arith.constant 0 : index
    %c0_2 = arith.constant 0 : index
    %1 = vector.load %arg2[%c0_1, %c0_2] : memref<32x4xf32, #tpu.memory_space<vmem>>, vector<32x4xf32>
    %cst = arith.constant dense<0.000000e+00> : vector<32x256xf32>
    %2 = tpu.matmul %1, %0, %cst {dimension_numbers = #tpu.dot_dimension_numbers<[1], [0], [0], [1], [0, 0, 1, 1], [], []>} : vector<32x4xf32>, vector<4x256xf32>, vector<32x256xf32> -> vector<32x256xf32>
    %c0_3 = arith.constant 0 : index
    %c0_4 = arith.constant 0 : index
    %3 = vector.load %arg3[%c0_3, %c0_4] : memref<32x1xf32, #tpu.memory_space<vmem>>, vector<32x1xf32>
    %4 = vector.broadcast %3 : vector<32x1xf32> to vector<32x256xf32>
    %5 = arith.addf %2, %4 : vector<32x256xf32>
    %6 = math.tanh %5 : vector<32x256xf32>
    %c0_5 = arith.constant 0 : index
    %c0_6 = arith.constant 0 : index
    %7 = vector.load %arg4[%c0_5, %c0_6] : memref<20x32xf32, #tpu.memory_space<vmem>>, vector<20x32xf32>
    %cst_7 = arith.constant dense<0.000000e+00> : vector<20x256xf32>
    %8 = tpu.matmul %7, %6, %cst_7 {dimension_numbers = #tpu.dot_dimension_numbers<[1], [0], [0], [1], [0, 0, 1, 1], [], []>} : vector<20x32xf32>, vector<32x256xf32>, vector<20x256xf32> -> vector<20x256xf32>
    %c0_8 = arith.constant 0 : index
    %c0_9 = arith.constant 0 : index
    %9 = vector.load %arg5[%c0_8, %c0_9] : memref<20x1xf32, #tpu.memory_space<vmem>>, vector<20x1xf32>
    %10 = vector.broadcast %9 : vector<20x1xf32> to vector<20x256xf32>
    %11 = arith.addf %8, %10 : vector<20x256xf32>
    %12 = vector.extract_strided_slice %11 {offsets = [0, 0], sizes = [5, 256], strides = [1, 1]} : vector<20x256xf32> to vector<5x256xf32>
    %cst_10 = arith.constant dense<0xFF800000> : vector<256xf32>
    %13 = vector.multi_reduction <maximumf>, %12, %cst_10 [0] : vector<5x256xf32> to vector<256xf32>
    %14 = vector.shape_cast %13 : vector<256xf32> to vector<1x256xf32>
    %15 = vector.broadcast %14 : vector<1x256xf32> to vector<5x256xf32>
    %16 = arith.subf %12, %15 : vector<5x256xf32>
    %17 = math.exp %16 : vector<5x256xf32>
    %cst_11 = arith.constant dense<0.000000e+00> : vector<256xf32>
    %18 = vector.multi_reduction <add>, %17, %cst_11 [0] : vector<5x256xf32> to vector<256xf32>
    %19 = vector.shape_cast %18 : vector<256xf32> to vector<1x256xf32>
    %20 = tpu.reciprocal %19 : vector<1x256xf32> -> vector<1x256xf32>
    %21 = vector.broadcast %20 : vector<1x256xf32> to vector<5x256xf32>
    %22 = arith.mulf %17, %21 : vector<5x256xf32>
    %c0_12 = arith.constant 0 : index
    %c0_13 = arith.constant 0 : index
    %23 = vector.load %arg6[%c0_12, %c0_13] : memref<5x256xf32, #tpu.memory_space<vmem>>, vector<5x256xf32>
    tpu.vector_store %arg6[%c0_12, %c0_13], %22 {strides = array<i32>} : memref<5x256xf32, #tpu.memory_space<vmem>>, vector<5x256xf32>,
    %24 = vector.extract_strided_slice %11 {offsets = [5, 0], sizes = [5, 256], strides = [1, 1]} : vector<20x256xf32> to vector<5x256xf32>
    %25 = math.exp %24 : vector<5x256xf32>
    %c0_14 = arith.constant 0 : index
    %c0_15 = arith.constant 0 : index
    %26 = vector.load %arg7[%c0_14, %c0_15] : memref<5x256xf32, #tpu.memory_space<vmem>>, vector<5x256xf32>
    tpu.vector_store %arg7[%c0_14, %c0_15], %25 {strides = array<i32>} : memref<5x256xf32, #tpu.memory_space<vmem>>, vector<5x256xf32>,
    %27 = vector.extract_strided_slice %11 {offsets = [10, 0], sizes = [10, 256], strides = [1, 1]} : vector<20x256xf32> to vector<10x256xf32>
    %c0_16 = arith.constant 0 : index
    %c0_17 = arith.constant 0 : index
    %28 = vector.load %arg8[%c0_16, %c0_17] : memref<10x256xf32, #tpu.memory_space<vmem>>, vector<10x256xf32>
    tpu.vector_store %arg8[%c0_16, %c0_17], %27 {strides = array<i32>} : memref<10x256xf32, #tpu.memory_space<vmem>>, vector<10x256xf32>,
    return
  }
  func.func @transform_0(%arg0: i32) -> (i32, i32) {
    %c0_i32 = arith.constant 0 : i32
    %c0_i32_0 = arith.constant 0 : i32
    return %c0_i32, %arg0 : i32, i32
  }
  func.func @transform_1(%arg0: i32) -> (i32, i32) {
    %c0_i32 = arith.constant 0 : i32
    %c0_i32_0 = arith.constant 0 : i32
    %c0_i32_1 = arith.constant 0 : i32
    return %c0_i32, %c0_i32_0 : i32, i32
  }
  func.func @transform_2(%arg0: i32) -> (i32, i32) {
    %c0_i32 = arith.constant 0 : i32
    %c0_i32_0 = arith.constant 0 : i32
    %c0_i32_1 = arith.constant 0 : i32
    return %c0_i32, %c0_i32_0 : i32, i32
  }
  func.func @transform_3(%arg0: i32) -> (i32, i32) {
    %c0_i32 = arith.constant 0 : i32
    %c0_i32_0 = arith.constant 0 : i32
    %c0_i32_1 = arith.constant 0 : i32
    return %c0_i32, %c0_i32_0 : i32, i32
  }
  func.func @transform_4(%arg0: i32) -> (i32, i32) {
    %c0_i32 = arith.constant 0 : i32
    %c0_i32_0 = arith.constant 0 : i32
    %c0_i32_1 = arith.constant 0 : i32
    return %c0_i32, %c0_i32_0 : i32, i32
  }
  func.func @transform_5(%arg0: i32) -> (i32, i32) {
    %c0_i32 = arith.constant 0 : i32
    %c0_i32_0 = arith.constant 0 : i32
    return %c0_i32, %arg0 : i32, i32
  }
  func.func @transform_6(%arg0: i32) -> (i32, i32) {
    %c0_i32 = arith.constant 0 : i32
    %c0_i32_0 = arith.constant 0 : i32
    return %c0_i32, %arg0 : i32, i32
  }
  func.func @transform_7(%arg0: i32) -> (i32, i32) {
    %c0_i32 = arith.constant 0 : i32
    %c0_i32_0 = arith.constant 0 : i32
    return %c0_i32, %arg0 : i32, i32
  }
}

</mosaic_0001>

<bundles_post_ra>
// kernel: mdn_forward.1
= control target key start
LH: loop header
LB: loop body
LE: loop exit
PB: predicated region body
PF: predicated region fallthrough
CT: control target
= control target key end

     0   :  { %13 = vsyncpa [#allocation3], 0  ;;  %v516_v2 = vmov 0   ;;  %s632_s0 = inlined_call_operand.vmem [shape: f32[4,256], index: 0, kind: input, shape index: {}]   ;;  %s633_s1 = inlined_call_operand.vmem [shape: f32[32,4], index: 1, kind: input, shape index: {}]   ;;  %s634_s2 = inlined_call_operand.vmem [shape: f32[32,1], index: 2, kind: input, shape index: {}]   ;;  %s635_s3 = inlined_call_operand.vmem [shape: f32[20,32], index: 3, kind: input, shape index: {}]   ;;  %s636_s4 = inlined_call_operand.vmem [shape: f32[20,1], index: 4, kind: input, shape index: {}]   ;;  %s637_s5 = inlined_call_operand.hbm [shape: f32[5,256], index: 5, kind: output, shape index: {0}]   ;;  %s638_s6 = inlined_call_operand.hbm [shape: f32[5,256], index: 6, kind: output, shape index: {1}]   ;;  %s639_s7 = inlined_call_operand.hbm [shape: f32[10,256], index: 7, kind: output, shape index: {2}]  }
   0x1   :  { %v25_v0 = vld [vmem:[%s632_s0] sm:$0xff]  ;;  %v31_v1 = vld [vmem:[%s634_s2 + $0x8] sm:$0xff]  ;;  %406 = vset.pattern.permute.xlu1 %v516_v2  ;;  %405 = vset.pattern.permute.xlu0 %v516_v2  ;;  %v33_v3 = vld [vmem:[%s634_s2 + $0x18] sm:$0xff] }
   0x2   :  { %55 = vst [vmem:[#allocation1] ss:$2 sm:$0xff] %v25_v0  ;;  %41 = vperm.xlu1 %406, %v31_v1   ;;  %51 = vperm.xlu0 %405, %v33_v3  }
   0x3   :  { %407 = vset.pattern.permute.xlu2 %v516_v2 }
   0x4   :  { %14 = vsyncpa [#allocation5], 0  ;;  %vm71_vm0 = vcmask 1043456   ;;  %v26_v4 = vld [vmem:[%s633_s1] sm:$0xff]  ;;  %vm58_vm1 = vcmask 31744   ;;  %v32_v6 = vld [vmem:[%s634_s2 + $0x10] sm:$0xff] }
   0x5   :  { %v30_v5 = vld [vmem:[%s634_s2] sm:$0xff]  ;;  %v27_v9 = vld [vmem:[%s633_s1 + $0x8] sm:$0xff]  ;;  %v147_v10 = vld [vmem:[%s636_s4 + $0x10] sm:$0xf]  ;;  %vm163_vm2 = vcmask 261120   ;;  %vm225_vm3 = vcmask 1044480  }
   0x6   :  { %v28_v11 = vld [vmem:[%s633_s1 + $0x10] sm:$0xff]  ;;  %v29_v12 = vld [vmem:[%s633_s1 + $0x18] sm:$0xff]  ;;  %v145_v29 = vld [vmem:[%s636_s4] sm:$0xff]  ;;  %vm319_vm4 = vcmask 1045504   ;;  %vm304_vm5 = vcmask 1042432   ;;  %s352_s30 = sshll.u32 %s638_s6, 4  ;;  %s353_s30 = int_to_ptr.hbm [resolvable:$true] %s352_s30 }
   0x7   :  { %150 = vperm.xlu2 %407, %v145_v29   ;;  %v146_v34 = vld [vmem:[%s636_s4 + $0x8] sm:$0xff]  ;;  %v142_v41 = vld [vmem:[%s635_s3] sm:$0xff]  ;;  %v144_v45 = vld [vmem:[%s635_s3 + $0x10] sm:$0xf]  ;;  %s518_s8 = smov [#allocation6]   ;;  %s362_s11 = sshll.u32 %s639_s7, 4  ;;  %s363_s11 = int_to_ptr.hbm [resolvable:$true] %s362_s11 }
   0x8   :  { %v143_v44 = vld [vmem:[%s635_s3 + $0x8] sm:$0xff]  ;;  %s517_s3 = smov [#allocation4]   ;;  %s360_s0 = sshll.u32 %s518_s8, 4  ;;  %s361_s0 = int_to_ptr.vmem [resolvable:$true] %s360_s0 }
   0x9   :  { %v56_v7 = vld.sshfl [vmem:[#allocation1] sm:$0xff pattern:$0x75316420]  ;;  %v57_v8 = vld.sshfl [vmem:[#allocation1 + $0x8] sm:$0xff pattern:$0x75316420] }
   0xa   :  { %383 = vmatpush.msk.msra.mxu0 %vm71_vm0, %v56_v7  ;;  %388 = vmatpush.msk.msra.mxu1 %vm71_vm0, %v57_v8  ;;  %s350_s27 = sshll.u32 %s517_s3, 4  ;;  %s519_s6 = smov 256   ;;  %s351_s27 = int_to_ptr.vmem [resolvable:$true] %s350_s27 }
   0xb   :  { %384 = vmatmul.msk.f32.vlgmr.msra.gmra.mxu0 %vm58_vm1, %v26_v4  ;;  %389 = vmatmul.msk.f32.vlgmr.msra.gmra.mxu1 %vm58_vm1, %v26_v4  ;;  %s520_s7 = smov 16   ;;  %s521_s12 = smov [#allocation2]  }
   0xc   :  { %36 = vperm.xlu1 %406, %v30_v5   ;;  %46 = vperm.xlu0 %405, %v32_v6   ;;  %s339_s13 = sshll.u32 %s521_s12, 4  ;;  %s341_s2 = sshll.u32 %s637_s5, 4  ;;  %s340_s13 = int_to_ptr.vmem [resolvable:$true] %s339_s13  ;;  %s342_s2 = int_to_ptr.hbm [resolvable:$true] %s341_s2 }
   0xf   :  { %155 = vperm.xlu2 %407, %v146_v34  }
  0x13   :  { %385 = vmatmul.msk.f32.gmra.mxu0 %vm58_vm1, %v27_v9  ;;  %390 = vmatmul.msk.f32.gmra.mxu1 %vm58_vm1, %v27_v9 }
  0x14   :  { %160 = vperm.xlu0 %405, %v147_v10  }
  0x1b   :  { %386 = vmatmul.msk.f32.gmra.mxu0 %vm58_vm1, %v28_v11  ;;  %391 = vmatmul.msk.f32.gmra.mxu1 %vm58_vm1, %v28_v11 }
  0x23   :  { %387 = vmatmul.msk.f32.gmra.mxu0 %vm58_vm1, %v29_v12  ;;  %392 = vmatmul.msk.f32.gmra.mxu1 %vm58_vm1, %v29_v12 }
  0x61   :  { %v151_v46 = vpop.permute.xlu2 %150 }
  0x69   :  { %v156_v58 = vpop.permute.xlu2 %155 }
  0x74   :  { %v52_v17 = vpop.permute.xlu0 %51  ;;  %v42_v18 = vpop.permute.xlu1 %41 }
  0x7e   :  { %v47_v21 = vpop.permute.xlu0 %46  ;;  %v37_v27 = vpop.permute.xlu1 %36 }
  0x86   :  { %v161_v11 = vpop.permute.xlu0 %160 }
  0x88   :  { %v93_v13 = vpop.f32.mrf.mxu0  ;;  %v122_v14 = vpop.f32.mrf.mxu1 }
  0x89   :  { %v94_v32 = vadd.f32 %v93_v13, %v37_v27  ;;  %v123_v33 = vadd.f32 %v122_v14, %v37_v27 }
  0x90   :  { %v96_v15 = vpop.f32.mrf.mxu0  ;;  %v125_v16 = vpop.f32.mrf.mxu1 }
  0x91   :  { %v97_v30 = vadd.f32 %v96_v15, %v42_v18  ;;  %v126_v31 = vadd.f32 %v125_v16, %v42_v18 }
  0x98   :  { %v99_v19 = vpop.f32.mrf.mxu0  ;;  %v128_v20 = vpop.f32.mrf.mxu1 }
  0x99   :  { %v100_v24 = vadd.f32 %v99_v19, %v47_v21  ;;  %v129_v28 = vadd.f32 %v128_v20, %v47_v21 }
  0xa0   :  { %v102_v22 = vpop.f32.mrf.mxu0  ;;  %v131_v23 = vpop.f32.mrf.mxu1 }
  0xa1   :  { %v103_v25 = vadd.f32 %v102_v22, %v52_v17  ;;  %v132_v26 = vadd.f32 %v131_v23, %v52_v17 }
  0xa3   :  { %408 = vtanh.f32 %v103_v25 }
  0xa4   :  { %410 = vtanh.f32 %v132_v26 }
  0xa5   :  { %412 = vtanh.f32 %v100_v24 }
  0xa6   :  { %414 = vtanh.f32 %v129_v28 }
  0xa7   :  { %416 = vtanh.f32 %v97_v30 }
  0xa8   :  { %418 = vtanh.f32 %v126_v31 }
  0xa9   :  { %v409_v35 = vpop.eup %408  ;;  %420 = vtanh.f32 %v94_v32 }
  0xaa   :  { %v411_v36 = vpop.eup %410  ;;  %422 = vtanh.f32 %v123_v33  ;;  %185 = vmatpush.msra.mxu2 %v409_v35 }
  0xab   :  { %v413_v37 = vpop.eup %412  ;;  %211 = vmatpush.msra.mxu3 %v411_v36 }
  0xac   :  { %v415_v38 = vpop.eup %414  ;;  %186 = vmatpush.msra.mxu2 %v413_v37 }
  0xad   :  { %v417_v39 = vpop.eup %416  ;;  %212 = vmatpush.msra.mxu3 %v415_v38 }
  0xae   :  { %v419_v40 = vpop.eup %418  ;;  %187 = vmatpush.msra.mxu2 %v417_v39 }
  0xaf   :  { %v421_v42 = vpop.eup %420  ;;  %213 = vmatpush.msra.mxu3 %v419_v40 }
  0xb0   :  { %v423_v43 = vpop.eup %422  ;;  %188 = vmatpush.msra.mxu2 %v421_v42 }
  0xb1   :  { %214 = vmatpush.msra.mxu3 %v423_v43  ;;  %393 = vmatmul.msk.f32.vlgmr.msra.gmra.mxu2 %vm163_vm2, %v142_v41 }
  0xb2   :  { %396 = vmatmul.msk.f32.vlgmr.msra.gmra.mxu3 %vm163_vm2, %v142_v41 }
  0xb9   :  { %394 = vmatmul.msk.f32.gmra.mxu2 %vm163_vm2, %v143_v44 }
  0xba   :  { %397 = vmatmul.msk.f32.gmra.mxu3 %vm163_vm2, %v143_v44 }
  0xc1   :  { %395 = vmatmul.msk.f32.gmra.mxu2 %vm163_vm2, %v144_v45 }
  0xc2   :  { %398 = vmatmul.msk.f32.gmra.mxu3 %vm163_vm2, %v144_v45 }
 0x134   :  { %v190_v47 = vpop.f32.mrf.mxu2 }
 0x135   :  { %v191_v48 = vadd.f32 %v190_v47, %v151_v46  ;;  %v216_v49 = vpop.f32.mrf.mxu3 }
 0x136   :  { %v217_v50 = vadd.f32 %v216_v49, %v151_v46 }
 0x137   :  { %v226_v51 = vsel %vm225_vm3, %v191_v48, -inf  ;;  %v292_v56 = vmul.f32 1.442695, %v191_v48 }
 0x138   :  { %v227_v52 = vrot.slane %v226_v51, 4  ;;  %v233_v53 = vsel %vm225_vm3, %v217_v50, -inf  ;;  %v294_v60 = vmul.f32 1.442695, %v217_v50 }
 0x139   :  { %v234_v54 = vrot.slane %v233_v53, 4  ;;  %424 = vpow2.f32 %v292_v56 }
 0x13a   :  { %v228_v55 = vmax.f32 %v226_v51, %v227_v52  ;;  %426 = vpow2.f32 %v294_v60 }
 0x13b   :  { %v235_v57 = vmax.f32 %v233_v53, %v234_v54 }
 0x13c   :  { %v229_v59 = vrot.slane %v228_v55, 2  ;;  %v193_v61 = vpop.f32.mrf.mxu2 }
 0x13d   :  { %v236_v62 = vrot.slane %v235_v57, 2  ;;  %v194_v63 = vadd.f32 %v193_v61, %v156_v58  ;;  %v219_v0 = vpop.f32.mrf.mxu3 }
 0x13e   :  { %v230_v1 = vmax.f32 %v228_v55, %v229_v59  ;;  %v220_v2 = vadd.f32 %v219_v0, %v156_v58 }
 0x13f   :  { %v237_v3 = vmax.f32 %v235_v57, %v236_v62  ;;  %v296_v4 = vmul.f32 1.442695, %v194_v63  ;;  %v425_v10 = vpop.eup %424  ;;  %v320_v23 = vrot.slane %v194_v63, 2 }
 0x140   :  { %v231_v5 = vrot.slane %v230_v1, 1  ;;  %v298_v6 = vmul.f32 1.442695, %v220_v2  ;;  %v427_v17 = vpop.eup %426  ;;  %v305_v21 = vrot.slane %v425_v10, 5  ;;  %v323_v27 = vrot.slane %v220_v2, 2 }
 0x141   :  { %v238_v7 = vrot.slane %v237_v3, 1  ;;  %428 = vpow2.f32 %v296_v4  ;;  %v308_v29 = vrot.slane %v427_v17, 5 }
 0x142   :  { %v232_v8 = vmax.f32 %v230_v1, %v231_v5  ;;  %430 = vpow2.f32 %v298_v6 }
 0x143   :  { %v239_v9 = vmax.f32 %v237_v3, %v238_v7 }
 0x144   :  { %v240_v12 = vsub.f32 %v191_v48, %v232_v8  ;;  %v196_v13 = vpop.f32.mrf.mxu2 }
 0x145   :  { %v241_v14 = vsub.f32 %v217_v50, %v239_v9  ;;  %v197_v15 = vadd.f32 %v196_v13, %v161_v11  ;;  %v222_v16 = vpop.f32.mrf.mxu3 }
 0x146   :  { %v242_v18 = vmul.f32 1.442695, %v240_v12  ;;  %v223_v19 = vadd.f32 %v222_v16, %v161_v11 }
 0x147   :  { %v429_v20 = vpop.eup %428  ;;  %v244_v22 = vmul.f32 1.442695, %v241_v14  ;;  %v321_v24 = vrot.slane %v197_v15, 2 }
 0x148   :  { %v431_v25 = vpop.eup %430  ;;  %432 = vpow2.f32 %v242_v18  ;;  %v306_v26 = vrot.slane %v429_v20, 5  ;;  %v324_v28 = vrot.slane %v223_v19, 2 }
 0x149   :  { %434 = vpow2.f32 %v244_v22  ;;  %v309_v30 = vrot.slane %v431_v25, 5  ;;  %v322_v31 = vsel %vm319_vm4, %v320_v23, %v321_v24  ;;  %332 = vst [vmem:[#allocation6 + $0x10] sm:$0x3] %v321_v24 }
 0x14a   :  { %330 = vst [vmem:[#allocation6] sm:$0xff] %v322_v31  ;;  %v325_v32 = vsel %vm319_vm4, %v323_v27, %v324_v28  ;;  %v307_v33 = vsel %vm304_vm5, %v305_v21, %v306_v26 }
 0x14b   :  { %331 = vst [vmem:[#allocation6 + $0x8] sm:$0xff] %v325_v32  ;;  %v310_v34 = vsel %vm304_vm5, %v308_v29, %v309_v30 }
 0x14c   :  { %333 = vst [vmem:[#allocation6 + $0x18] sm:$0x3] %v324_v28 }
 0x14d   :  { %313 = vst [vmem:[#allocation4] sm:$0x1f] %v307_v33 }
 0x14e   :  { %v433_v35 = vpop.eup %432  ;;  %314 = vst [vmem:[#allocation4 + $0x8] sm:$0x1f] %v310_v34 }
 0x14f   :  { %v435_v36 = vpop.eup %434  ;;  %v246_v37 = vsel %vm225_vm3, %v433_v35, 0.0  ;;  %355 = dma.vmem_to_hbm [thread:$0]  %s351_s27, 256, %s353_s30, [#allocation5]  }
 0x150   :  { %v247_v38 = vrot.slane %v246_v37, 4  ;;  %v253_v39 = vsel %vm225_vm3, %v435_v36, 0.0  ;;  %368 = dma.vmem_to_hbm [thread:$0]  %s361_s0, 512, %s363_s11, [#allocation5], %s519_s6, %s519_s6, %s520_s7  }
 0x151   :  { %v254_v40 = vrot.slane %v253_v39, 4 }
 0x152   :  { %v248_v41 = vadd.f32 %v247_v38, %v246_v37 }
 0x153   :  { %v255_v42 = vadd.f32 %v254_v40, %v253_v39 }
 0x154   :  { %v249_v43 = vrot.slane %v248_v41, 2 }
 0x155   :  { %v256_v44 = vrot.slane %v255_v42, 2 }
 0x156   :  { %v250_v45 = vadd.f32 %v249_v43, %v248_v41 }
 0x157   :  { %v257_v46 = vadd.f32 %v256_v44, %v255_v42 }
 0x158   :  { %v251_v47 = vrot.slane %v250_v45, 1 }
 0x159   :  { %v258_v48 = vrot.slane %v257_v46, 1 }
 0x15a   :  { %v252_v49 = vadd.f32 %v251_v47, %v250_v45 }
 0x15b   :  { %v259_v50 = vadd.f32 %v258_v48, %v257_v46 }
 0x15c   :  { %436 = vrcp.f32 %v252_v49  ;;  %v271_v56 = vand.u32 2147483648, %v252_v49  ;;  %v269_v59 = vand.u32 2147483647, %v252_v49  ;;  %vm265_vm8 = vweird.f32 %v252_v49 }
 0x15d   :  { %438 = vrcp.f32 %v259_v50  ;;  %v285_v60 = vand.u32 2147483648, %v259_v50  ;;  %v283_v62 = vand.u32 2147483647, %v259_v50  ;;  %vm279_vm10 = vweird.f32 %v259_v50 }
 0x15e   :  { %v272_v0 = vor.u32 1.1754944e-38, %v271_v56  ;;  %vm270_vm11 = vcmp.eq.f32.partialorder %v269_v59, 8.507059e+37 }
 0x15f   :  { %v286_v3 = vor.u32 1.1754944e-38, %v285_v60  ;;  %vm284_vm13 = vcmp.eq.f32.partialorder %v283_v62, 8.507059e+37 }
 0x162   :  { %v437_v51 = vpop.eup %436 }
 0x163   :  { %v439_v52 = vpop.eup %438  ;;  %v261_v53 = vmul.f32 %v437_v51, %v252_v49  ;;  %vm266_vm6 = vweird.f32 %v437_v51 }
 0x164   :  { %v275_v54 = vmul.f32 %v439_v52, %v259_v50  ;;  %vm280_vm7 = vweird.f32 %v439_v52  ;;  %vm267_vm9 = vmor %vm265_vm8, %vm266_vm6 }
 0x165   :  { %v262_v55 = vsub.f32 1.0, %v261_v53  ;;  %vm281_vm12 = vmor %vm279_vm10, %vm280_vm7 }
 0x166   :  { %v276_v57 = vsub.f32 1.0, %v275_v54 }
 0x167   :  { %v263_v58 = vmul.f32 %v437_v51, %v262_v55 }
 0x168   :  { %v277_v61 = vmul.f32 %v439_v52, %v276_v57 }
 0x169   :  { %v264_v63 = vadd.f32 %v437_v51, %v263_v58 }
 0x16a   :  { %v278_v1 = vadd.f32 %v439_v52, %v277_v61 }
 0x16b   :  { %v268_v2 = vsel %vm267_vm9, %v437_v51, %v264_v63 }
 0x16c   :  { %v273_v4 = vsel %vm270_vm11, %v272_v0, %v268_v2  ;;  %v282_v5 = vsel %vm281_vm12, %v439_v52, %v278_v1 }
 0x16d   :  { %v287_v6 = vsel %vm284_vm13, %v286_v3, %v282_v5  ;;  %v288_v7 = vmul.f32 %v433_v35, %v273_v4 }
 0x16e   :  { %v289_v8 = vmul.f32 %v435_v36, %v287_v6 }
 0x16f   :  { %290 = vst [vmem:[#allocation2] sm:$0x1f] %v288_v7 }
 0x170   :  { %291 = vst [vmem:[#allocation2 + $0x8] sm:$0x1f] %v289_v8 }
 0x171   :  { %344 = dma.vmem_to_hbm [thread:$0]  %s340_s13, 256, %s342_s2, [#allocation3]  }
 0x172   :  { %512 = dma.done.wait [#allocation3], 256  }
 0x173   :  { %513 = vsyncadd [#allocation3], 4294967040 }
 0x174   :  { %514 = dma.done.wait [#allocation5], 768  }
 0x175   :  { %515 = vsyncadd [#allocation5], 4294966528 }
 0x176   :  { %381 = vsyncpa [#allocation3], 1 }
 0x177   :  { %382 = vsyncpa [#allocation5], 1 }

</bundles_post_ra>
